<compile_context>
chip_gen: v6e
topology: v6e:2x2x1
jax: 0.10.0
libtpu: 0.0.40
codegen_flags: <defaults>
</compile_context>

<pallas_src>
import jax
import jax.numpy as jnp
from jax import lax
from jax.experimental import pallas as pl
from jax.experimental.pallas import tpu as pltpu
import numpy as np


def _round_up(x: int, m: int) -> int:
    return ((x + m - 1) // m) * m


def _make_cluster_assignment_kernel(inv_alpha: float, k_actual: int, k_pad: int):
    """Pallas kernel for one batch tile of the DEC soft assignment."""

    def kernel(x_ref, c_ref, c_sq_ref, o_ref):
        x = x_ref[...]          # (TB, D)      f32, pipelined per grid step
        c = c_ref[...]          # (K_pad, D)   f32, resident across grid steps

        # MXU: cross[b, k] = sum_d x[b, d] * c[k, d]  (contract last dims, no transpose op)
        cross = lax.dot_general(
            x, c,
            dimension_numbers=(((1,), (1,)), ((), ())),
            preferred_element_type=jnp.float32,
        )                                                     # (TB, K_pad)

        x_sq = jnp.sum(x * x, axis=-1, keepdims=True)         # (TB, 1)   VPU/XLU, tiny
        norm_sq = x_sq + c_sq_ref[...] - 2.0 * cross          # (TB, K_pad)
        # Cancellation in the dot formulation can give tiny negatives -> clamp.
        norm_sq = jnp.maximum(norm_sq, 0.0)

        # Student's t numerator; /alpha folded into a constant multiply, divide -> EUP.
        numerator = pl.reciprocal(1.0 + norm_sq * inv_alpha)  # exact reciprocal

        if k_pad != k_actual:
            # Zero out padded (fake) clusters so they don't contaminate the denominator.
            col = lax.broadcasted_iota(jnp.int32, numerator.shape, 1)
            numerator = jnp.where(col < k_actual, numerator, 0.0)

        denom = jnp.sum(numerator, axis=-1, keepdims=True)    # (TB, 1)
        o_ref[...] = numerator * pl.reciprocal(denom)

    return kernel


def cluster_assignment(batch, cluster_centers, alpha=1.0, block_b=512):
    """
    batch:           [B, D] float32
    cluster_centers: [K, D] float32
    returns:         [B, K] float32 soft assignments (rows sum to 1)
    """
    batch = jnp.asarray(batch, jnp.float32)
    cluster_centers = jnp.asarray(cluster_centers, jnp.float32)
    B, D = batch.shape
    K, D2 = cluster_centers.shape
    assert D == D2

    # Lane-dense / MXU-friendly cluster dimension.
    K_pad = _round_up(max(K, 128), 128)
    # Sublane-aligned batch tile; cap so double-buffered x tiles + resident centers
    # + (TB, K_pad) score tiles comfortably fit the smaller v7x scoped VMEM budget.
    TB = min(int(block_b), _round_up(B, 8))
    B_pad = _round_up(B, TB)

    x_p = batch
    if B_pad != B:
        x_p = jnp.pad(x_p, ((0, B_pad - B), (0, 0)))
    c_p = cluster_centers
    if K_pad != K:
        c_p = jnp.pad(c_p, ((0, K_pad - K), (0, 0)))

    # Hoisted once, reused by every batch tile (kept out of the kernel so that the
    # "parallel" batch grid axis can be sharded across TensorCores without an
    # initialization race on per-core scratch).
    c_sq = jnp.sum(c_p * c_p, axis=-1, keepdims=True).T      # (1, K_pad)

    kernel = _make_cluster_assignment_kernel(1.0 / float(alpha), K, K_pad)

    out = pl.pallas_call(
        kernel,
        out_shape=jax.ShapeDtypeStruct((B_pad, K_pad), jnp.float32),
        grid_spec=pltpu.PrefetchScalarGridSpec(
            num_scalar_prefetch=0,
            grid=(B_pad // TB,),
            in_specs=[
                pl.BlockSpec((TB, D), lambda i: (i, 0)),       # batch tile (pipelined)
                pl.BlockSpec((K_pad, D), lambda i: (0, 0)),    # centers: resident
                pl.BlockSpec((1, K_pad), lambda i: (0, 0)),    # ||c||^2: resident
            ],
            out_specs=pl.BlockSpec((TB, K_pad), lambda i: (i, 0)),
        ),
        compiler_params=pltpu.CompilerParams(
            dimension_semantics=("parallel",),                 # 2x on v7x megacore
        ),
    )(x_p, c_p, c_sq)

    return out[:B, :K]


def xavier_uniform(key, shape):
    # torch.nn.init.xavier_uniform_ on a 2D tensor [K, D]: fan_out=K, fan_in=D
    fan_out, fan_in = shape
    limit = float(np.sqrt(6.0 / (fan_in + fan_out)))
    return jax.random.uniform(key, shape, minval=-limit, maxval=limit,
                              dtype=jnp.float32)


if __name__ == "__main__":
    B = 8            # batch size
    D = 32           # embedding dimension
    K = 16           # number of clusters
    ALPHA = 1.0

    key = jax.random.PRNGKey(0)
    k_x, k_c = jax.random.split(key)
    x = jax.random.normal(k_x, (B, D), dtype=jnp.float32)
    centers = xavier_uniform(k_c, (K, D))   # deterministic parameter init

    out = cluster_assignment(x, centers, alpha=ALPHA)
    out = jax.block_until_ready(out)

    # sanity check against plain-JAX reference (direct broadcast formulation)
    norm_sq = jnp.sum((x[:, None, :] - centers[None, :, :]) ** 2, axis=2)
    num = 1.0 / (1.0 + norm_sq / ALPHA)
    ref = num / jnp.sum(num, axis=1, keepdims=True)
    np.testing.assert_allclose(np.asarray(out), np.asarray(ref),
                               rtol=1e-5, atol=2e-6)

    print("KERNEL_OK")
</pallas_src>

<mosaic_0001>
module attributes {stable_mosaic.version = 11 : i64} {
  func.func @kernel(%arg0: i32, %arg1: memref<8x32xf32, #tpu.memory_space<vmem>>, %arg2: memref<128x32xf32, #tpu.memory_space<vmem>>, %arg3: memref<1x128xf32, #tpu.memory_space<vmem>>, %arg4: memref<8x128xf32, #tpu.memory_space<vmem>>) attributes {dimension_semantics = [#tpu.dimension_semantics<parallel>], iteration_bounds = array<i64: 1>, scalar_prefetch = 0 : i64, scratch_operands = 0 : i64, tpu.core_type = #tpu.core_type<tc>, window_params = [{transform_indices = @transform_0, window_bounds = array<i64: 8, 32>}, {pipeline_mode = #tpu.pipeline_mode<synchronous>, transform_indices = @transform_1, window_bounds = array<i64: 128, 32>}, {pipeline_mode = #tpu.pipeline_mode<synchronous>, transform_indices = @transform_2, window_bounds = array<i64: 1, 128>}, {transform_indices = @transform_3, window_bounds = array<i64: 8, 128>}]} {
    %c0 = arith.constant 0 : index
    %c0_0 = arith.constant 0 : index
    %0 = vector.load %arg1[%c0, %c0_0] : memref<8x32xf32, #tpu.memory_space<vmem>>, vector<8x32xf32>
    %c0_1 = arith.constant 0 : index
    %c0_2 = arith.constant 0 : index
    %1 = vector.load %arg2[%c0_1, %c0_2] : memref<128x32xf32, #tpu.memory_space<vmem>>, vector<128x32xf32>
    %cst = arith.constant dense<0.000000e+00> : vector<8x128xf32>
    %2 = tpu.matmul %0, %1, %cst {dimension_numbers = #tpu.dot_dimension_numbers<[1], [1], [0], [0], [0, 0, 1, 0], [], []>} : vector<8x32xf32>, vector<128x32xf32>, vector<8x128xf32> -> vector<8x128xf32>
    %3 = arith.mulf %0, %0 : vector<8x32xf32>
    %cst_3 = arith.constant dense<0.000000e+00> : vector<8xf32>
    %4 = vector.multi_reduction <add>, %3, %cst_3 [1] : vector<8x32xf32> to vector<8xf32>
    %5 = vector.shape_cast %4 : vector<8xf32> to vector<8x1xf32>
    %c0_4 = arith.constant 0 : index
    %c0_5 = arith.constant 0 : index
    %6 = vector.load %arg3[%c0_4, %c0_5] : memref<1x128xf32, #tpu.memory_space<vmem>>, vector<1x128xf32>
    %7 = vector.broadcast %5 : vector<8x1xf32> to vector<8x128xf32>
    %8 = vector.broadcast %6 : vector<1x128xf32> to vector<8x128xf32>
    %9 = arith.addf %7, %8 : vector<8x128xf32>
    %cst_6 = arith.constant 2.000000e+00 : f32
    %10 = vector.broadcast %cst_6 : f32 to vector<8x128xf32>
    %11 = arith.mulf %10, %2 : vector<8x128xf32>
    %12 = arith.subf %9, %11 : vector<8x128xf32>
    %cst_7 = arith.constant 0.000000e+00 : f32
    %13 = vector.broadcast %cst_7 : f32 to vector<8x128xf32>
    %14 = arith.maximumf %12, %13 : vector<8x128xf32>
    %cst_8 = arith.constant 1.000000e+00 : f32
    %15 = vector.broadcast %cst_8 : f32 to vector<8x128xf32>
    %16 = arith.mulf %14, %15 : vector<8x128xf32>
    %cst_9 = arith.constant 1.000000e+00 : f32
    %17 = vector.broadcast %cst_9 : f32 to vector<8x128xf32>
    %18 = arith.addf %17, %16 : vector<8x128xf32>
    %19 = tpu.reciprocal %18 : vector<8x128xf32> -> vector<8x128xf32>
    %20 = tpu.iota {dimensions = array<i32: 1>} : vector<8x128xi32>
    %c16_i32 = arith.constant 16 : i32
    %21 = vector.broadcast %c16_i32 : i32 to vector<8x128xi32>
    %22 = arith.cmpi slt, %20, %21 : vector<8x128xi32>
    %cst_10 = arith.constant 0.000000e+00 : f32
    %23 = vector.broadcast %cst_10 : f32 to vector<8x128xf32>
    %24 = arith.select %22, %19, %23 : vector<8x128xi1>, vector<8x128xf32>
    %cst_11 = arith.constant dense<0.000000e+00> : vector<8xf32>
    %25 = vector.multi_reduction <add>, %24, %cst_11 [1] : vector<8x128xf32> to vector<8xf32>
    %26 = vector.shape_cast %25 : vector<8xf32> to vector<8x1xf32>
    %27 = tpu.reciprocal %26 : vector<8x1xf32> -> vector<8x1xf32>
    %28 = vector.broadcast %27 : vector<8x1xf32> to vector<8x128xf32>
    %29 = arith.mulf %24, %28 : vector<8x128xf32>
    %c0_12 = arith.constant 0 : index
    %c0_13 = arith.constant 0 : index
    %30 = vector.load %arg4[%c0_12, %c0_13] : memref<8x128xf32, #tpu.memory_space<vmem>>, vector<8x128xf32>
    tpu.vector_store %arg4[%c0_12, %c0_13], %29 {strides = array<i32>} : memref<8x128xf32, #tpu.memory_space<vmem>>, vector<8x128xf32>,
    return
  }
  func.func @transform_0(%arg0: i32) -> (i32, i32) {
    %c0_i32 = arith.constant 0 : i32
    %c0_i32_0 = arith.constant 0 : i32
    return %arg0, %c0_i32 : i32, i32
  }
  func.func @transform_1(%arg0: i32) -> (i32, i32) {
    %c0_i32 = arith.constant 0 : i32
    %c0_i32_0 = arith.constant 0 : i32
    %c0_i32_1 = arith.constant 0 : i32
    return %c0_i32, %c0_i32_0 : i32, i32
  }
  func.func @transform_2(%arg0: i32) -> (i32, i32) {
    %c0_i32 = arith.constant 0 : i32
    %c0_i32_0 = arith.constant 0 : i32
    %c0_i32_1 = arith.constant 0 : i32
    return %c0_i32, %c0_i32_0 : i32, i32
  }
  func.func @transform_3(%arg0: i32) -> (i32, i32) {
    %c0_i32 = arith.constant 0 : i32
    %c0_i32_0 = arith.constant 0 : i32
    return %arg0, %c0_i32 : i32, i32
  }
}

</mosaic_0001>

<bundles_post_ra>
// kernel: tpu_custom_call.1
= control target key start
LH: loop header
LB: loop body
LE: loop exit
PB: predicated region body
PF: predicated region fallthrough
CT: control target
= control target key end

     0   :  { %vm32_vm0 = vcmask 261120   ;;  %v293_v1 = vmov 0.0   ;;  %vm294_vm1 = vmmov 0   ;;  %s391_s0 = inlined_call_operand.vmem [shape: f32[8,32], index: 0, kind: input, shape index: {}]   ;;  %s392_s1 = inlined_call_operand.vmem [shape: f32[128,32], index: 1, kind: input, shape index: {}]   ;;  %s393_s2 = inlined_call_operand.vmem [shape: f32[1,128], index: 2, kind: input, shape index: {}]   ;;  %s394_s3 = inlined_call_operand.hbm [shape: f32[8,128], index: 3, kind: output, shape index: {}]  }
   0x1   :  { %v31_v0 = vld [vmem:[%s392_s1 + $0x78] sm:$0xff]  ;;  %229 = vmatprep.subr.mxu0 %v293_v1  ;;  %261 = vmatprep.mubr.msk.f32.mxu0 %vm294_vm1, %v293_v1  ;;  %v30_v2 = vld [vmem:[%s392_s1 + $0x70] sm:$0xff]  ;;  %v15_v3 = vld [vmem:[%s391_s0] sm:$0xff] }
   0x2   :  { %230 = vmatpush3.xpose.msk.msra.mxu0 %vm32_vm0, %v31_v0  ;;  %v154_v4 = vmul.f32 %v15_v3, %v15_v3 }
   0x3   :  { %231 = vmatprep.subr.mxu0 %v293_v1 }
   0x6   :  { %232 = vmatpush3.xpose.msk.msra.mxu0 %vm32_vm0, %v30_v2 }
   0x7   :  { %8 = vsyncpa [#allocation3], 0  ;;  %233 = vmatprep.subr.mxu0 %v293_v1  ;;  %v29_v5 = vld [vmem:[%s392_s1 + $0x68] sm:$0xff]  ;;  %v155_v6 = vsel %vm32_vm0, %v154_v4, 0.0  ;;  %v28_v7 = vld [vmem:[%s392_s1 + $0x60] sm:$0xff]  ;;  %v171_v29 = vlaneseq }
   0x8   :  { %156 = vadd.xlane.f32.xlu0 %v155_v6  ;;  %v27_v8 = vld [vmem:[%s392_s1 + $0x58] sm:$0xff]  ;;  %v26_v9 = vld [vmem:[%s392_s1 + $0x50] sm:$0xff]  ;;  %v25_v10 = vld [vmem:[%s392_s1 + $0x48] sm:$0xff] }
   0x9   :  { %v24_v11 = vld [vmem:[%s392_s1 + $0x40] sm:$0xff]  ;;  %v23_v12 = vld [vmem:[%s392_s1 + $0x38] sm:$0xff]  ;;  %v22_v13 = vld [vmem:[%s392_s1 + $0x30] sm:$0xff]  ;;  %v172_v30 = vand.u32 127, %v171_v29 }
   0xa   :  { %234 = vmatpush3.xpose.msk.msra.mxu0 %vm32_vm0, %v29_v5  ;;  %v21_v14 = vld [vmem:[%s392_s1 + $0x28] sm:$0xff]  ;;  %v20_v15 = vld [vmem:[%s392_s1 + $0x20] sm:$0xff]  ;;  %v19_v16 = vld [vmem:[%s392_s1 + $0x18] sm:$0xff] }
   0xb   :  { %235 = vmatprep.subr.mxu0 %v293_v1  ;;  %v18_v17 = vld [vmem:[%s392_s1 + $0x10] sm:$0xff]  ;;  %v17_v18 = vld [vmem:[%s392_s1 + $0x8] sm:$0xff]  ;;  %v16_v19 = vld [vmem:[%s392_s1] sm:$0xff]  ;;  %vm173_vm2 = vcmp.lt.s32.totalorder %v172_v30, 16  ;;  %s295_s1 = smov [#allocation2]  }
   0xc   :  { %v211_v20 = vld [vmem:[%s393_s2] ss:$0 sm:$0xff]  ;;  %s186_s20 = sshll.u32 %s295_s1, 4  ;;  %s187_s20 = int_to_ptr.vmem [resolvable:$true] %s186_s20 }
   0xd   :  { %s271_s2 = scalar_lea.vmem %s187_s20, 128  ;;  %p276_p1 = scmp.lt.s32.totalorder %s187_s20, %s187_s20 }
   0xe   :  { %236 = vmatpush3.xpose.msk.msra.mxu0 %vm32_vm0, %v28_v7  ;;  %p272_p0 = scmp.ne.s32.totalorder %s187_s20, %s271_s2  ;;  %p277_p2 = scmp.lt.s32.totalorder %s271_s2, %s271_s2 }
   0xf   :  { %237 = vmatprep.subr.mxu0 %v293_v1 }
  0x10   :  { %p278_p3 = por %p277_p2, %p276_p1 }
  0x12   :  { %238 = vmatpush3.xpose.msk.msra.mxu0 %vm32_vm0, %v27_v8  ;;  %p279_p4 = pnand %p278_p3, %p272_p0 }
  0x13   :  { %239 = vmatprep.subr.mxu0 %v293_v1 }
  0x16   :  { %240 = vmatpush3.xpose.msk.msra.mxu0 %vm32_vm0, %v26_v9 }
  0x17   :  { %241 = vmatprep.subr.mxu0 %v293_v1 }
  0x1a   :  { %242 = vmatpush3.xpose.msk.msra.mxu0 %vm32_vm0, %v25_v10 }
  0x1b   :  { %243 = vmatprep.subr.mxu0 %v293_v1 }
  0x1e   :  { %244 = vmatpush3.xpose.msk.msra.mxu0 %vm32_vm0, %v24_v11 }
  0x1f   :  { %245 = vmatprep.subr.mxu0 %v293_v1 }
  0x22   :  { %246 = vmatpush3.xpose.msk.msra.mxu0 %vm32_vm0, %v23_v12 }
  0x23   :  { %247 = vmatprep.subr.mxu0 %v293_v1 }
  0x26   :  { %248 = vmatpush3.xpose.msk.msra.mxu0 %vm32_vm0, %v22_v13 }
  0x27   :  { %249 = vmatprep.subr.mxu0 %v293_v1 }
  0x2a   :  { %250 = vmatpush3.xpose.msk.msra.mxu0 %vm32_vm0, %v21_v14 }
  0x2b   :  { %251 = vmatprep.subr.mxu0 %v293_v1 }
  0x2e   :  { %252 = vmatpush3.xpose.msk.msra.mxu0 %vm32_vm0, %v20_v15 }
  0x2f   :  { %253 = vmatprep.subr.mxu0 %v293_v1 }
  0x32   :  { %254 = vmatpush3.xpose.msk.msra.mxu0 %vm32_vm0, %v19_v16 }
  0x33   :  { %255 = vmatprep.subr.mxu0 %v293_v1 }
  0x36   :  { %256 = vmatpush3.xpose.msk.msra.mxu0 %vm32_vm0, %v18_v17 }
  0x37   :  { %257 = vmatprep.subr.mxu0 %v293_v1 }
  0x3a   :  { %258 = vmatpush3.xpose.msk.msra.mxu0 %vm32_vm0, %v17_v18 }
  0x3b   :  { %259 = vmatprep.subr.mxu0 %v293_v1 }
  0x3e   :  { %260 = vmatpush3.xpose.msk.msra.mxu0 %vm32_vm0, %v16_v19 }
  0x41   :  { %262 = vmatmul.mubr.msk.f32.vlgmr.msra.gmra.mxu0 %vm32_vm0, %v15_v3 }
  0x91   :  { %v157_v21 = vpop.xlane.xlu0 %156 }
  0x92   :  { %v165_v22 = vadd.f32 %v211_v20, %v157_v21 }
 0x101   :  { %v150_v23 = vpop.f32.mrf.mxu0 }
 0x102   :  { %v166_v24 = vmul.f32 2.0, %v150_v23 }
 0x103   :  { %v263_v25 = vpop.f32.mrf.mxu0 }
 0x104   :  { %v167_v26 = vsub.f32 %v165_v22, %v166_v24 }
 0x106   :  { %v168_v27 = vmax.f32 %v167_v26, 0.0 }
 0x108   :  { %v169_v28 = vadd.f32 1.0, %v168_v27 }
 0x10a   :  { %267 = vrcp.f32 %v169_v28 }
 0x117   :  { %v268_v31 = vpop.eup %267 }
 0x118   :  { %v174_v32 = vsel %vm173_vm2, %v268_v31, 0.0 }
 0x119   :  { %175 = vadd.xlane.f32.xlu0 %v174_v32 }
 0x1a2   :  { %v176_v33 = vpop.xlane.xlu0 %175 }
 0x1a3   :  { %269 = vrcp.f32 %v176_v33 }
 0x1b0   :  { %v270_v34 = vpop.eup %269 }
 0x1b1   :  { %v178_v35 = vmul.f32 %v270_v34, %v174_v32 }
 0x1b3   :  { %179 = vst [vmem:[#allocation2] sm:$0xff] %v178_v35 }
 0x1b4   :  { %282 = shalt.err (!%p279_p4)
}
 0x1b5   :  { %189 = dma.vmem_to_hbm [thread:$0]  %s187_s20, 128, %s394_s3, [#allocation3]  }
 0x1b6   :  { %291 = dma.done.wait [#allocation3], 128  }
 0x1b7   :  { %292 = vsyncadd [#allocation3], 4294967168 }
 0x1b8   :  { %193 = vsyncpa [#allocation3], 1 }

</bundles_post_ra>
